<compile_context>
chip_gen: v7x
topology: tpu7x:2x2x1
jax: 0.10.0
libtpu: 0.0.40
codegen_flags: <defaults>
</compile_context>

<pallas_src>
import functools

import jax
import jax.numpy as jnp
import numpy as np
from jax.experimental import pallas as pl
from jax.experimental.pallas import tpu as pltpu


# Memory-space enum (new name, with fallback for slightly older jax).
_MEMSPACE = getattr(pltpu, "MemorySpace", None) or getattr(pltpu, "TPUMemorySpace")
_VMEM = _MEMSPACE.VMEM


def _round_up(x, m):
    return (x + m - 1) // m * m


def _vmem_budget_bytes():
    """~75% of physical VMEM (128 MiB v5e/v6e, 64 MiB per-TC v7x); conservative fallback."""
    cap = 64 * 1024 * 1024
    try:
        info = pltpu.get_tpu_info()
        cap = int(getattr(info, "vmem_capacity_bytes", cap))
    except Exception:
        pass
    return int((cap // 4) * 3)


# --------------------- Fully-resident fused kernel (small graphs) ---------------------

def _resident_kernel(adj_ref, e0_ref, out_ref, *, n_layers):
    """Whole LightGCN forward, fully resident in VMEM.

    adj_ref : (Np, Np)  block adjacency [[u2u, u2i], [i2u, i2i]]  (f32 or bf16)
    e0_ref  : (Np, Dp)  initial [user; item] embedding, f32, padded to 128-multiples
    out_ref : (Np, Dp)  mean over {e0, layer_1, ..., layer_n_layers}
    """
    adj = adj_ref[...]
    acc = e0_ref[...]                          # f32 running sum (replaces stack + mean)
    e = acc.astype(adj.dtype)                  # matmul operand stays in adjacency dtype
    for _ in range(n_layers):                  # small static int -> unrolled
        e_new = jnp.dot(adj, e, preferred_element_type=jnp.float32)
        acc = acc + e_new
        e = e_new.astype(adj.dtype)
    out_ref[...] = (acc * (1.0 / (n_layers + 1))).astype(out_ref.dtype)


def _forward_resident(adj, e0, n_layers, vmem_limit):
    Np, Dp = e0.shape
    kernel = functools.partial(_resident_kernel, n_layers=n_layers)
    cost = pl.CostEstimate(
        flops=2 * n_layers * Np * Np * Dp,
        transcendentals=0,
        bytes_accessed=int(adj.size) * adj.dtype.itemsize + 2 * Np * Dp * 4,
    )
    return pl.pallas_call(
        kernel,
        out_shape=jax.ShapeDtypeStruct((Np, Dp), jnp.float32),
        # No grid -> no pipeline double-buffering: one VMEM buffer per operand.
        in_specs=[
            pl.BlockSpec(memory_space=_VMEM),   # adjacency (dominant VMEM term)
            pl.BlockSpec(memory_space=_VMEM),   # e0
        ],
        out_specs=pl.BlockSpec(memory_space=_VMEM),
        input_output_aliases={1: 0},            # reuse e0's HBM buffer for the output
        cost_estimate=cost,
        compiler_params=pltpu.CompilerParams(vmem_limit_bytes=int(vmem_limit)),
    )(adj, e0)


# --------------------- Row-tiled streamed path (large graphs / v7x) --------------------

def _layer_row_kernel(adj_ref, e_ref, acc_ref, e_out_ref, acc_out_ref, *, scale):
    """One adjacency row stripe of one LightGCN layer, layer-mean accumulation fused.

    adj_ref : (TM, Np)  streamed adjacency row stripe (bf16 in HBM for the roofline)
    e_ref   : (Np, Dp)  previous-layer embedding, resident across row tiles
    acc_ref : (TM, Dp)  f32 running sum stripe
    """
    e_new = jnp.dot(adj_ref[...], e_ref[...], preferred_element_type=jnp.float32)
    e_out_ref[...] = e_new.astype(e_out_ref.dtype)
    acc_new = acc_ref[...] + e_new
    if scale is not None:                       # final layer: fold in the 1/(L+1) mean
        acc_new = acc_new * scale
    acc_out_ref[...] = acc_new.astype(acc_out_ref.dtype)


def _layer_call(adj, e, acc, *, tm, scale, vmem_limit):
    Np, Dp = acc.shape
    n_tiles = Np // tm
    kernel = functools.partial(_layer_row_kernel, scale=scale)
    cost = pl.CostEstimate(
        flops=2 * Np * Np * Dp,
        transcendentals=0,
        bytes_accessed=(int(adj.size) * adj.dtype.itemsize
                        + 2 * int(e.size) * e.dtype.itemsize
                        + 2 * Np * Dp * 4),
    )
    return pl.pallas_call(
        kernel,
        out_shape=(jax.ShapeDtypeStruct((Np, Dp), e.dtype),      # E' (next layer input)
                   jax.ShapeDtypeStruct((Np, Dp), jnp.float32)),  # updated running sum
        grid=(n_tiles,),
        in_specs=[
            pl.BlockSpec((tm, Np), lambda i: (i, 0)),   # adjacency row stripe, streamed
            pl.BlockSpec((Np, Dp), lambda i: (0, 0)),   # embedding resident across tiles
            pl.BlockSpec((tm, Dp), lambda i: (i, 0)),   # running-sum stripe
        ],
        out_specs=(
            pl.BlockSpec((tm, Dp), lambda i: (i, 0)),
            pl.BlockSpec((tm, Dp), lambda i: (i, 0)),
        ),
        cost_estimate=cost,
        compiler_params=pltpu.CompilerParams(
            dimension_semantics=("parallel",),          # both v7x TensorCores
            vmem_limit_bytes=int(vmem_limit),
        ),
    )(adj, e, acc)


def _forward_tiled(adj, e0, n_layers, tm, vmem_limit):
    Np, Dp = e0.shape
    assert Np % tm == 0, "row tile must divide the (128-padded) node count"
    acc = e0                                    # f32 running sum starts at the input embedding
    e = e0.astype(adj.dtype)                    # streamed operand stays in adjacency dtype
    for l in range(n_layers):
        scale = (1.0 / (n_layers + 1)) if l == n_layers - 1 else None
        e, acc = _layer_call(adj, e, acc, tm=tm, scale=scale, vmem_limit=vmem_limit)
    return acc


# ----------------------------------- Model wrapper -------------------------------------

def build_block_adjacency(u2u_adj, u2i_adj, i2u_adj, i2i_adj, dtype=jnp.bfloat16, pad_to=128):
    """Assemble + zero-pad the block adjacency [[u2u, u2i], [i2u, i2i]] ONCE (static w.r.t.
    the graph). Padding both dims to a multiple of 128 keeps adjacency loads lane-dense and
    the MXU contraction aligned, and covers bf16 (16) / int8-fp8 (32) sublane tiles."""
    nu = u2u_adj.shape[0]
    ni = i2i_adj.shape[0]
    n = nu + ni
    np_ = _round_up(n, pad_to)
    adj = jnp.concatenate(
        [jnp.concatenate([u2u_adj, u2i_adj], axis=1),
         jnp.concatenate([i2u_adj, i2i_adj], axis=1)], axis=0)
    return jnp.pad(adj, ((0, np_ - n), (0, np_ - n))).astype(dtype)


def lightgcn_forward(user_emb, item_emb, adj_blk, n_layers, mode="auto", tm=128,
                     lane_pad=128, row_pad=128):
    """LightGCN forward. adj_blk must come from build_block_adjacency (pre-padded, built
    once outside the jitted step). Embedding padding is done here (cheap, NxD)."""
    nu, d = user_emb.shape
    ni, _ = item_emb.shape
    n = nu + ni
    np_ = _round_up(n, row_pad)
    dp = _round_up(d, lane_pad)
    assert adj_blk.shape == (np_, np_), "adjacency must be pre-padded via build_block_adjacency"

    e0 = jnp.concatenate([user_emb, item_emb], axis=0)
    e0 = jnp.pad(e0, ((0, np_ - n), (0, dp - d))).astype(jnp.float32)

    vmem_limit = _vmem_budget_bytes()
    if mode == "auto":
        # adjacency + e0 + out, each single-buffered in VMEM on the resident path.
        resident_bytes = int(adj_blk.size) * adj_blk.dtype.itemsize + 3 * np_ * dp * 4
        mode = "resident" if resident_bytes <= vmem_limit else "tiled"

    if mode == "resident":
        out = _forward_resident(adj_blk, e0, n_layers, vmem_limit)
    else:
        out = _forward_tiled(adj_blk, e0, n_layers, tm, vmem_limit)
    return out[:nu, :d], out[nu:n, :d]


def lightgcn_forward_ref(user_emb, item_emb, u2u_adj, u2i_adj, i2u_adj, i2i_adj, n_layers):
    """Pure-JAX reference (mirrors the torch forward with the chosen flags)."""
    user_layers = [user_emb]
    item_layers = [item_emb]
    u, it = user_emb, item_emb
    for _ in range(n_layers):
        new_u = u2u_adj @ u + u2i_adj @ it
        new_i = i2i_adj @ it + i2u_adj @ u
        u, it = new_u, new_i
        user_layers.append(u)
        item_layers.append(it)
    return (jnp.mean(jnp.stack(user_layers, 0), axis=0),
            jnp.mean(jnp.stack(item_layers, 0), axis=0))


def xavier_uniform(key, shape):
    fan_in, fan_out = shape[0], shape[1]
    bound = float(np.sqrt(6.0 / (fan_in + fan_out)))
    return jax.random.uniform(key, shape, jnp.float32, minval=-bound, maxval=bound)


# ---------------------------------------- Main -----------------------------------------

if __name__ == "__main__":
    num_users, num_items, embed_dim, n_layers = 64, 96, 32, 2
    key = jax.random.PRNGKey(0)
    (k_u, k_i, k_uu, k_ii, k_ui0, k_ui1, k_iu0, k_iu1) = jax.random.split(key, 8)

    # Deterministic "checkpoint": xavier_uniform embeddings (nn.init.xavier_uniform_).
    user_emb = xavier_uniform(k_u, (num_users, embed_dim))
    item_emb = xavier_uniform(k_i, (num_items, embed_dim))

    # Synthetic dense adjacency matrices (stand-ins for the torch sparse graphs).
    # beh_u2i_fold_list / beh_i2u_fold_list are row-folds of the full u2i / i2u adjacency;
    # concatenating fold spmm results == full-matrix spmm, so build independent folds
    # (distinct PRNG keys) and concatenate.
    u2u_adj = jax.random.uniform(k_uu, (num_users, num_users), jnp.float32) * 0.05
    i2i_adj = jax.random.uniform(k_ii, (num_items, num_items), jnp.float32) * 0.05
    u2i_fold0 = jax.random.uniform(k_ui0, (num_users // 2, num_items), jnp.float32) * 0.05
    u2i_fold1 = jax.random.uniform(k_ui1, (num_users - num_users // 2, num_items), jnp.float32) * 0.03
    i2u_fold0 = jax.random.uniform(k_iu0, (num_items // 2, num_users), jnp.float32) * 0.05
    i2u_fold1 = jax.random.uniform(k_iu1, (num_items - num_items // 2, num_users), jnp.float32) * 0.03
    u2i_adj = jnp.concatenate([u2i_fold0, u2i_fold1], axis=0)   # [num_users, num_items]
    i2u_adj = jnp.concatenate([i2u_fold0, i2u_fold1], axis=0)   # [num_items, num_users]

    u_ref, i_ref = lightgcn_forward_ref(
        user_emb, item_emb, u2u_adj, u2i_adj, i2u_adj, i2i_adj, n_layers)

    # Block adjacency assembled + padded ONCE, outside the jitted forward.
    adj_f32 = build_block_adjacency(u2u_adj, u2i_adj, i2u_adj, i2i_adj, dtype=jnp.float32)
    adj_bf16 = build_block_adjacency(u2u_adj, u2i_adj, i2u_adj, i2i_adj, dtype=jnp.bfloat16)

    def run(mode, adj, rtol, atol):
        fwd = jax.jit(functools.partial(lightgcn_forward, n_layers=n_layers, mode=mode, tm=128))
        u_out, i_out = fwd(user_emb, item_emb, adj)
        jax.block_until_ready((u_out, i_out))
        np.testing.assert_allclose(np.asarray(u_out), np.asarray(u_ref), rtol=rtol, atol=atol)
        np.testing.assert_allclose(np.asarray(i_out), np.asarray(i_ref), rtol=rtol, atol=atol)

    # Fully-resident single fused kernel: exact f32 path and bf16-operand MXU path.
    run("resident", adj_f32, 1e-5, 1e-5)
    run("resident", adj_bf16, 3e-2, 3e-2)

    # Row-tiled streamed path (adjacency stripes over a "parallel" grid, one call per layer):
    # the scaling path for large graphs and for both v7x TensorCores.
    run("tiled", adj_f32, 1e-5, 1e-5)
    run("tiled", adj_bf16, 3e-2, 3e-2)

    print("KERNEL_OK")
</pallas_src>

<mosaic_0001>
module attributes {stable_mosaic.version = 11 : i64} {
  func.func @_resident_kernel(%arg0: memref<256x256xf32, #tpu.memory_space<vmem>>, %arg1: memref<256x128xf32, #tpu.memory_space<vmem>>, %arg2: memref<256x128xf32, #tpu.memory_space<vmem>>) attributes {dimension_semantics = [], scalar_prefetch = 0 : i64, scratch_operands = 0 : i64, tpu.core_type = #tpu.core_type<tc>} {
    %c0 = arith.constant 0 : index
    %c0_0 = arith.constant 0 : index
    %0 = vector.load %arg0[%c0, %c0_0] : memref<256x256xf32, #tpu.memory_space<vmem>>, vector<256x256xf32>
    %c0_1 = arith.constant 0 : index
    %c0_2 = arith.constant 0 : index
    %1 = vector.load %arg1[%c0_1, %c0_2] : memref<256x128xf32, #tpu.memory_space<vmem>>, vector<256x128xf32>
    %cst = arith.constant dense<0.000000e+00> : vector<256x128xf32>
    %2 = tpu.matmul %0, %1, %cst {dimension_numbers = #tpu.dot_dimension_numbers<[1], [0], [0], [1], [0, 0, 1, 1], [], []>} : vector<256x256xf32>, vector<256x128xf32>, vector<256x128xf32> -> vector<256x128xf32>
    %3 = arith.addf %1, %2 : vector<256x128xf32>
    %cst_3 = arith.constant dense<0.000000e+00> : vector<256x128xf32>
    %4 = tpu.matmul %0, %2, %cst_3 {dimension_numbers = #tpu.dot_dimension_numbers<[1], [0], [0], [1], [0, 0, 1, 1], [], []>} : vector<256x256xf32>, vector<256x128xf32>, vector<256x128xf32> -> vector<256x128xf32>
    %5 = arith.addf %3, %4 : vector<256x128xf32>
    %cst_4 = arith.constant 0.333333343 : f32
    %6 = vector.broadcast %cst_4 : f32 to vector<256x128xf32>
    %7 = arith.mulf %5, %6 : vector<256x128xf32>
    %c0_5 = arith.constant 0 : index
    %c0_6 = arith.constant 0 : index
    %8 = vector.load %arg2[%c0_5, %c0_6] : memref<256x128xf32, #tpu.memory_space<vmem>>, vector<256x128xf32>
    tpu.vector_store %arg2[%c0_5, %c0_6], %7 {strides = array<i32>} : memref<256x128xf32, #tpu.memory_space<vmem>>, vector<256x128xf32>,
    return
  }
}

</mosaic_0001>

<bundles_post_ra>
// kernel: lightgcn_forward.1
= control target key start
LH: loop header
LB: loop body
LE: loop exit
PB: predicated region body
PF: predicated region fallthrough
CT: control target
= control target key end

     0   :  { %v1729_v0 = vmov 0.0|0.0   ;;  %s1726_s1 = inlined_call_operand.vmem [shape: f32[256,128], index: 1, kind: input, shape index: {}, may-alias: {1,2}]   ;;  %s1727_s0 = inlined_call_operand.vmem [shape: f32[256,256], index: 0, kind: input, shape index: {}]   ;;  %s1728_s2 = inlined_call_operand.vmem [shape: f32[256,128], index: 2, kind: output, shape index: {}, may-alias: {1,2}]  }
   0x1   :  { %689 = vmatprep.subr.bf16.mxu0 %v1729_v0  ;;  %v806_v1 = vld [vmem:[%s1726_s1] sm:$0xff]  ;;  %v811_v2 = vld [vmem:[%s1726_s1 + $0x8] sm:$0xff]  ;;  %v816_v3 = vld [vmem:[%s1726_s1 + $0x10] sm:$0xff]  ;;  %737 = vmatprep.subr.bf16.mxu1 %v1729_v0 }
   0x2   :  { %1801 = vst [vmem:[#allocation2_spill] sm:$0xff] %v806_v1  ;;  %1802 = vst [vmem:[#allocation3_spill] sm:$0xff] %v811_v2  ;;  %v690_v4 = vpack.c.bf16 %v811_v2, %v806_v1  ;;  %v824_v5 = vld [vmem:[%s1726_s1 + $0x18] sm:$0xff]  ;;  %v832_v7 = vld [vmem:[%s1726_s1 + $0x20] sm:$0xff] }
   0x3   :  { %1803 = vst [vmem:[#allocation4_spill] sm:$0xff] %v816_v3  ;;  %1804 = vst [vmem:[#allocation5_spill] sm:$0xff] %v824_v5  ;;  %v693_v6 = vpack.c.bf16 %v824_v5, %v816_v3  ;;  %v837_v8 = vld [vmem:[%s1726_s1 + $0x28] sm:$0xff]  ;;  %v845_v10 = vld [vmem:[%s1726_s1 + $0x30] sm:$0xff] }
   0x4   :  { %691 = vmatpush1.bf16.msra.mxu0 %v690_v4  ;;  %1805 = vst [vmem:[#allocation6_spill] sm:$0xff] %v832_v7  ;;  %1806 = vst [vmem:[#allocation7_spill] sm:$0xff] %v837_v8  ;;  %v696_v9 = vpack.c.bf16 %v837_v8, %v832_v7  ;;  %v850_v11 = vld [vmem:[%s1726_s1 + $0x38] sm:$0xff]  ;;  %v12_v12 = vld [vmem:[%s1727_s0 + $0x8] sm:$0xff] }
   0x5   :  { %692 = vmatprep.subr.bf16.mxu0 %v1729_v0  ;;  %1807 = vst [vmem:[#allocation8_spill] sm:$0xff] %v845_v10  ;;  %1808 = vst [vmem:[#allocation9_spill] sm:$0xff] %v850_v11  ;;  %v699_v13 = vpack.c.bf16 %v850_v11, %v845_v10  ;;  %171 = vmatprep.mubr.f32.mxu0 %v12_v12  ;;  %v861_v14 = vld [vmem:[%s1726_s1 + $0x40] sm:$0xff]  ;;  %v866_v15 = vld [vmem:[%s1726_s1 + $0x48] sm:$0xff] }
   0x6   :  { %1809 = vst [vmem:[#allocation10_spill] sm:$0xff] %v861_v14  ;;  %1810 = vst [vmem:[#allocation11_spill] sm:$0xff] %v866_v15  ;;  %428 = vmatprep.mubr.f32.mxu1 %v12_v12  ;;  %v702_v16 = vpack.c.bf16 %v866_v15, %v861_v14  ;;  %v874_v17 = vld [vmem:[%s1726_s1 + $0x50] sm:$0xff]  ;;  %v879_v18 = vld [vmem:[%s1726_s1 + $0x58] sm:$0xff] }
   0x7   :  { %1811 = vst [vmem:[#allocation12_spill] sm:$0xff] %v874_v17  ;;  %1812 = vst [vmem:[#allocation13_spill] sm:$0xff] %v879_v18  ;;  %v705_v19 = vpack.c.bf16 %v879_v18, %v874_v17  ;;  %v887_v20 = vld [vmem:[%s1726_s1 + $0x60] sm:$0xff]  ;;  %v892_v21 = vld [vmem:[%s1726_s1 + $0x68] sm:$0xff] }
   0x8   :  { %694 = vmatpush1.bf16.msra.mxu0 %v693_v6  ;;  %1813 = vst [vmem:[#allocation14_spill] sm:$0xff] %v887_v20  ;;  %1814 = vst [vmem:[#allocation15_spill] sm:$0xff] %v892_v21  ;;  %v708_v22 = vpack.c.bf16 %v892_v21, %v887_v20  ;;  %v900_v23 = vld [vmem:[%s1726_s1 + $0x70] sm:$0xff]  ;;  %v905_v24 = vld [vmem:[%s1726_s1 + $0x78] sm:$0xff] }
   0x9   :  { %695 = vmatprep.subr.bf16.mxu0 %v1729_v0  ;;  %1815 = vst [vmem:[#allocation16_spill] sm:$0xff] %v900_v23  ;;  %1816 = vst [vmem:[#allocation17_spill] sm:$0xff] %v905_v24  ;;  %v711_v25 = vpack.c.bf16 %v905_v24, %v900_v23  ;;  %v913_v26 = vld [vmem:[%s1726_s1 + $0x80] sm:$0xff]  ;;  %v918_v27 = vld [vmem:[%s1726_s1 + $0x88] sm:$0xff] }
   0xa   :  { %1817 = vst [vmem:[#allocation18_spill] sm:$0xff] %v913_v26  ;;  %1818 = vst [vmem:[#allocation19_spill] sm:$0xff] %v918_v27  ;;  %v714_v28 = vpack.c.bf16 %v918_v27, %v913_v26  ;;  %v926_v29 = vld [vmem:[%s1726_s1 + $0x90] sm:$0xff]  ;;  %v931_v30 = vld [vmem:[%s1726_s1 + $0x98] sm:$0xff] }
   0xb   :  { %1819 = vst [vmem:[#allocation20_spill] sm:$0xff] %v926_v29  ;;  %1820 = vst [vmem:[#allocation21_spill] sm:$0xff] %v931_v30  ;;  %v717_v31 = vpack.c.bf16 %v931_v30, %v926_v29  ;;  %v939_v32 = vld [vmem:[%s1726_s1 + $0xa0] sm:$0xff]  ;;  %v944_v33 = vld [vmem:[%s1726_s1 + $0xa8] sm:$0xff] }
   0xc   :  { %697 = vmatpush1.bf16.msra.mxu0 %v696_v9  ;;  %1821 = vst [vmem:[#allocation22_spill] sm:$0xff] %v939_v32  ;;  %1822 = vst [vmem:[#allocation23_spill] sm:$0xff] %v944_v33  ;;  %v720_v34 = vpack.c.bf16 %v944_v33, %v939_v32  ;;  %v952_v35 = vld [vmem:[%s1726_s1 + $0xb0] sm:$0xff]  ;;  %v957_v36 = vld [vmem:[%s1726_s1 + $0xb8] sm:$0xff] }
   0xd   :  { %698 = vmatprep.subr.bf16.mxu0 %v1729_v0  ;;  %1823 = vst [vmem:[#allocation24_spill] sm:$0xff] %v952_v35  ;;  %1824 = vst [vmem:[#allocation25_spill] sm:$0xff] %v957_v36  ;;  %v723_v37 = vpack.c.bf16 %v957_v36, %v952_v35  ;;  %v965_v38 = vld [vmem:[%s1726_s1 + $0xc0] sm:$0xff]  ;;  %v970_v39 = vld [vmem:[%s1726_s1 + $0xc8] sm:$0xff] }
   0xe   :  { %1825 = vst [vmem:[#allocation26_spill] sm:$0xff] %v965_v38  ;;  %1826 = vst [vmem:[#allocation27_spill] sm:$0xff] %v970_v39  ;;  %v726_v40 = vpack.c.bf16 %v970_v39, %v965_v38  ;;  %v978_v41 = vld [vmem:[%s1726_s1 + $0xd0] sm:$0xff]  ;;  %v983_v42 = vld [vmem:[%s1726_s1 + $0xd8] sm:$0xff] }
   0xf   :  { %1827 = vst [vmem:[#allocation28_spill] sm:$0xff] %v978_v41  ;;  %1828 = vst [vmem:[#allocation29_spill] sm:$0xff] %v983_v42  ;;  %v729_v43 = vpack.c.bf16 %v983_v42, %v978_v41  ;;  %v991_v44 = vld [vmem:[%s1726_s1 + $0xe0] sm:$0xff]  ;;  %v996_v45 = vld [vmem:[%s1726_s1 + $0xe8] sm:$0xff] }
  0x10   :  { %700 = vmatpush1.bf16.msra.mxu0 %v699_v13  ;;  %1829 = vst [vmem:[#allocation30_spill] sm:$0xff] %v991_v44  ;;  %1830 = vst [vmem:[#allocation31_spill] sm:$0xff] %v996_v45  ;;  %v732_v46 = vpack.c.bf16 %v996_v45, %v991_v44  ;;  %v1004_v47 = vld [vmem:[%s1726_s1 + $0xf0] sm:$0xff]  ;;  %v1009_v48 = vld [vmem:[%s1726_s1 + $0xf8] sm:$0xff] }
  0x11   :  { %701 = vmatprep.subr.bf16.mxu0 %v1729_v0  ;;  %1831 = vst [vmem:[#allocation32_spill] sm:$0xff] %v1004_v47  ;;  %1832 = vst [vmem:[#allocation33_spill] sm:$0xff] %v1009_v48  ;;  %v735_v49 = vpack.c.bf16 %v1009_v48, %v1004_v47  ;;  %v1017_v50 = vld [vmem:[%s1727_s0] sm:$0xff]  ;;  %v1022_v51 = vld [vmem:[%s1727_s0 + $0x18] sm:$0xff] }
  0x12   :  { %v1029_v52 = vld [vmem:[%s1727_s0 + $0x10] sm:$0xff]  ;;  %v1034_v53 = vld [vmem:[%s1727_s0 + $0x28] sm:$0xff]  ;;  %v1041_v54 = vld [vmem:[%s1727_s0 + $0x20] sm:$0xff] }
  0x13   :  { %v1046_v55 = vld [vmem:[%s1727_s0 + $0x38] sm:$0xff]  ;;  %v1053_v56 = vld [vmem:[%s1727_s0 + $0x30] sm:$0xff]  ;;  %v1058_v57 = vld [vmem:[%s1727_s0 + $0x48] sm:$0xff] }
  0x14   :  { %703 = vmatpush1.bf16.msra.mxu0 %v702_v16  ;;  %v1065_v58 = vld [vmem:[%s1727_s0 + $0x40] sm:$0xff]  ;;  %v1070_v59 = vld [vmem:[%s1727_s0 + $0x58] sm:$0xff]  ;;  %v1077_v60 = vld [vmem:[%s1727_s0 + $0x50] sm:$0xff] }
  0x15   :  { %704 = vmatprep.subr.bf16.mxu0 %v1729_v0  ;;  %v1082_v61 = vld [vmem:[%s1727_s0 + $0x68] sm:$0xff]  ;;  %v1089_v62 = vld [vmem:[%s1727_s0 + $0x60] sm:$0xff]  ;;  %v1094_v63 = vld [vmem:[%s1727_s0 + $0x78] sm:$0xff] }
  0x16   :  { %v1101_v4 = vld [vmem:[%s1727_s0 + $0x70] sm:$0xff]  ;;  %v1106_v6 = vld [vmem:[%s1727_s0 + $0x88] sm:$0xff]  ;;  %v1113_v9 = vld [vmem:[%s1727_s0 + $0x80] sm:$0xff] }
  0x17   :  { %v1118_v12 = vld [vmem:[%s1727_s0 + $0x98] sm:$0xff]  ;;  %v1125_v13 = vld [vmem:[%s1727_s0 + $0x90] sm:$0xff]  ;;  %v1130_v16 = vld [vmem:[%s1727_s0 + $0xa8] sm:$0xff] }
  0x18   :  { %706 = vmatpush1.bf16.msra.mxu0 %v705_v19  ;;  %v1137_v19 = vld [vmem:[%s1727_s0 + $0xa0] sm:$0xff]  ;;  %v1214_v47 = vld [vmem:[%s1727_s0 + $0x118] sm:$0xff]  ;;  %v1221_v45 = vld [vmem:[%s1727_s0 + $0x110] sm:$0xff] }
  0x19   :  { %707 = vmatprep.subr.bf16.mxu0 %v1729_v0  ;;  %v1209_v48 = vld [vmem:[%s1727_s0 + $0x100] sm:$0xff]  ;;  %v1226_v44 = vld [vmem:[%s1727_s0 + $0x128] sm:$0xff]  ;;  %v1238_v41 = vld [vmem:[%s1727_s0 + $0x138] sm:$0xff] }
  0x1a   :  { %v1233_v42 = vld [vmem:[%s1727_s0 + $0x120] sm:$0xff]  ;;  %v1245_v39 = vld [vmem:[%s1727_s0 + $0x130] sm:$0xff]  ;;  %v1250_v38 = vld [vmem:[%s1727_s0 + $0x148] sm:$0xff] }
  0x1b   :  { %v1257_v36 = vld [vmem:[%s1727_s0 + $0x140] sm:$0xff]  ;;  %v1262_v35 = vld [vmem:[%s1727_s0 + $0x158] sm:$0xff]  ;;  %v1269_v33 = vld [vmem:[%s1727_s0 + $0x150] sm:$0xff] }
  0x1c   :  { %709 = vmatpush1.bf16.msra.mxu0 %v708_v22  ;;  %v1142_v22 = vld [vmem:[%s1727_s0 + $0xb8] sm:$0xff]  ;;  %v1274_v32 = vld [vmem:[%s1727_s0 + $0x168] sm:$0xff]  ;;  %v1281_v30 = vld [vmem:[%s1727_s0 + $0x160] sm:$0xff] }
  0x1d   :  { %710 = vmatprep.subr.bf16.mxu0 %v1729_v0  ;;  %v1286_v29 = vld [vmem:[%s1727_s0 + $0x178] sm:$0xff]  ;;  %v1293_v27 = vld [vmem:[%s1727_s0 + $0x170] sm:$0xff]  ;;  %v1298_v26 = vld [vmem:[%s1727_s0 + $0x188] sm:$0xff] }
  0x1e   :  { %v1305_v24 = vld [vmem:[%s1727_s0 + $0x180] sm:$0xff]  ;;  %v1310_v23 = vld [vmem:[%s1727_s0 + $0x198] sm:$0xff]  ;;  %v1317_v21 = vld [vmem:[%s1727_s0 + $0x190] sm:$0xff] }
  0x1f   :  { %v1322_v20 = vld [vmem:[%s1727_s0 + $0x1a8] sm:$0xff]  ;;  %v1329_v18 = vld [vmem:[%s1727_s0 + $0x1a0] sm:$0xff]  ;;  %v1334_v17 = vld [vmem:[%s1727_s0 + $0x1b8] sm:$0xff] }
  0x20   :  { %712 = vmatpush1.bf16.msra.mxu0 %v711_v25  ;;  %v1149_v25 = vld [vmem:[%s1727_s0 + $0xb0] sm:$0xff]  ;;  %1833 = vst [vmem:[#allocation34_spill] sm:$0xff] %v1329_v18  ;;  %1834 = vst [vmem:[#allocation35_spill] sm:$0xff] %v1334_v17  ;;  %v1346_v14 = vld [vmem:[%s1727_s0 + $0x1c8] sm:$0xff] }
  0x21   :  { %713 = vmatprep.subr.bf16.mxu0 %v1729_v0  ;;  %v1341_v15 = vld [vmem:[%s1727_s0 + $0x1b0] sm:$0xff]  ;;  %1836 = vst [vmem:[#allocation37_spill] sm:$0xff] %v1346_v14  ;;  %v1353_v11 = vld [vmem:[%s1727_s0 + $0x1c0] sm:$0xff]  ;;  %v1358_v10 = vld [vmem:[%s1727_s0 + $0x1d8] sm:$0xff] }
  0x22   :  { %1835 = vst [vmem:[#allocation36_spill] sm:$0xff] %v1341_v15  ;;  %1837 = vst [vmem:[#allocation38_spill] sm:$0xff] %v1353_v11  ;;  %v1365_v8 = vld [vmem:[%s1727_s0 + $0x1d0] sm:$0xff]  ;;  %v1370_v7 = vld [vmem:[%s1727_s0 + $0x1e8] sm:$0xff] }
  0x23   :  { %1838 = vst [vmem:[#allocation39_spill] sm:$0xff] %v1358_v10  ;;  %1839 = vst [vmem:[#allocation40_spill] sm:$0xff] %v1365_v8  ;;  %v1377_v5 = vld [vmem:[%s1727_s0 + $0x1e0] sm:$0xff]  ;;  %v1382_v3 = vld [vmem:[%s1727_s0 + $0x1f8] sm:$0xff] }
  0x24   :  { %715 = vmatpush1.bf16.msra.mxu0 %v714_v28  ;;  %v1154_v28 = vld [vmem:[%s1727_s0 + $0xc8] sm:$0xff]  ;;  %1840 = vst [vmem:[#allocation41_spill] sm:$0xff] %v1370_v7  ;;  %1841 = vst [vmem:[#allocation42_spill] sm:$0xff] %v1377_v5  ;;  %v1389_v2 = vld [vmem:[%s1727_s0 + $0x1f0] sm:$0xff] }
  0x25   :  { %716 = vmatprep.subr.bf16.mxu0 %v1729_v0  ;;  %1842 = vst [vmem:[#allocation43_spill] sm:$0xff] %v1382_v3  ;;  %1843 = vst [vmem:[#allocation44_spill] sm:$0xff] %v1389_v2 }
  0x28   :  { %718 = vmatpush1.bf16.msra.mxu0 %v717_v31  ;;  %v1161_v31 = vld [vmem:[%s1727_s0 + $0xc0] sm:$0xff] }
  0x29   :  { %719 = vmatprep.subr.bf16.mxu0 %v1729_v0 }
  0x2c   :  { %721 = vmatpush1.bf16.msra.mxu0 %v720_v34  ;;  %v1166_v34 = vld [vmem:[%s1727_s0 + $0xd8] sm:$0xff] }
  0x2d   :  { %722 = vmatprep.subr.bf16.mxu0 %v1729_v0 }
  0x30   :  { %724 = vmatpush1.bf16.msra.mxu0 %v723_v37  ;;  %v1173_v37 = vld [vmem:[%s1727_s0 + $0xd0] sm:$0xff] }
  0x31   :  { %725 = vmatprep.subr.bf16.mxu0 %v1729_v0 }
  0x34   :  { %727 = vmatpush1.bf16.msra.mxu0 %v726_v40  ;;  %v1178_v40 = vld [vmem:[%s1727_s0 + $0xe8] sm:$0xff] }
  0x35   :  { %728 = vmatprep.subr.bf16.mxu0 %v1729_v0 }
  0x38   :  { %730 = vmatpush1.bf16.msra.mxu0 %v729_v43  ;;  %v1185_v43 = vld [vmem:[%s1727_s0 + $0xe0] sm:$0xff] }
  0x39   :  { %731 = vmatprep.subr.bf16.mxu0 %v1729_v0 }
  0x3c   :  { %733 = vmatpush1.bf16.msra.mxu0 %v732_v46  ;;  %v1190_v46 = vld [vmem:[%s1727_s0 + $0xf8] sm:$0xff] }
  0x3d   :  { %734 = vmatprep.subr.bf16.mxu0 %v1729_v0  ;;  %v1202_v0 = vld [vmem:[%s1727_s0 + $0x108] sm:$0xff] }
  0x40   :  { %736 = vmatpush1.bf16.msra.mxu0 %v735_v49  ;;  %v1197_v49 = vld [vmem:[%s1727_s0 + $0xf0] sm:$0xff] }
  0x43   :  { %172 = vmatmul.mubr.f32.vlgmr.msra.gmra.mrb[0].mxu0 %v1017_v50 }
  0x44   :  { %176 = vmatprep.mubr.f32.mxu0 %v1022_v51 }
  0x47   :  { %177 = vmatmul.mubr.f32.gmra.mrb[2].mxu0 %v1029_v52 }
  0x48   :  { %181 = vmatprep.mubr.f32.mxu0 %v1034_v53 }
  0x4b   :  { %182 = vmatmul.mubr.f32.gmra.mrb[4].mxu0 %v1041_v54 }
  0x4c   :  { %186 = vmatprep.mubr.f32.mxu0 %v1046_v55 }
  0x4f   :  { %187 = vmatmul.mubr.f32.gmra.mrb[6].mxu0 %v1053_v56 }
  0x50   :  { %191 = vmatprep.mubr.f32.mxu0 %v1058_v57 }
  0x53   :  { %192 = vmatmul.mubr.f32.gmra.mrb[8].mxu0 %v1065_v58 }
  0x54   :  { %196 = vmatprep.mubr.f32.mxu0 %v1070_v59 }
  0x57   :  { %197 = vmatmul.mubr.f32.gmra.mrb[10].mxu0 %v1077_v60 }
  0x58   :  { %201 = vmatprep.mubr.f32.mxu0 %v1082_v61 }
  0x5b   :  { %202 = vmatmul.mubr.f32.gmra.mrb[12].mxu0 %v1089_v62 }
  0x5c   :  { %206 = vmatprep.mubr.f32.mxu0 %v1094_v63 }
  0x5f   :  { %207 = vmatmul.mubr.f32.gmra.mrb[14].mxu0 %v1101_v4 }
  0x60   :  { %211 = vmatprep.mubr.f32.mxu0 %v1106_v6 }
  0x63   :  { %212 = vmatmul.mubr.f32.gmra.mrb[16].mxu0 %v1113_v9 }
  0x64   :  { %216 = vmatprep.mubr.f32.mxu0 %v1118_v12 }
  0x67   :  { %217 = vmatmul.mubr.f32.gmra.mrb[18].mxu0 %v1125_v13 }
  0x68   :  { %221 = vmatprep.mubr.f32.mxu0 %v1130_v16 }
  0x6b   :  { %222 = vmatmul.mubr.f32.gmra.mrb[20].mxu0 %v1137_v19 }
  0x6c   :  { %226 = vmatprep.mubr.f32.mxu0 %v1142_v22 }
  0x6f   :  { %227 = vmatmul.mubr.f32.gmra.mrb[22].mxu0 %v1149_v25 }
  0x70   :  { %231 = vmatprep.mubr.f32.mxu0 %v1154_v28 }
  0x73   :  { %232 = vmatmul.mubr.f32.gmra.mrb[24].mxu0 %v1161_v31 }
  0x74   :  { %236 = vmatprep.mubr.f32.mxu0 %v1166_v34 }
  0x77   :  { %237 = vmatmul.mubr.f32.gmra.mrb[26].mxu0 %v1173_v37 }
  0x78   :  { %241 = vmatprep.mubr.f32.mxu0 %v1178_v40 }
  0x7b   :  { %242 = vmatmul.mubr.f32.gmra.mrb[28].mxu0 %v1185_v43 }
  0x7c   :  { %246 = vmatprep.mubr.f32.mxu0 %v1190_v46 }
  0x7f   :  { %247 = vmatmul.mubr.f32.gmra.mrb[30].mxu0 %v1197_v49 }
  0x80   :  { %251 = vmatprep.mubr.f32.mxu0 %v1202_v0 }
  0x83   :  { %252 = vmatmul.mubr.f32.gmra.mrb[32].mxu0 %v1209_v48 }
  0x84   :  { %256 = vmatprep.mubr.f32.mxu0 %v1214_v47 }
  0x87   :  { %257 = vmatmul.mubr.f32.gmra.mrb[34].mxu0 %v1221_v45 }
  0x88   :  { %261 = vmatprep.mubr.f32.mxu0 %v1226_v44 }
  0x8b   :  { %262 = vmatmul.mubr.f32.gmra.mrb[36].mxu0 %v1233_v42 }
  0x8c   :  { %266 = vmatprep.mubr.f32.mxu0 %v1238_v41 }
  0x8f   :  { %267 = vmatmul.mubr.f32.gmra.mrb[38].mxu0 %v1245_v39 }
  0x90   :  { %271 = vmatprep.mubr.f32.mxu0 %v1250_v38 }
  0x93   :  { %272 = vmatmul.mubr.f32.gmra.mrb[40].mxu0 %v1257_v36 }
  0x94   :  { %276 = vmatprep.mubr.f32.mxu0 %v1262_v35 }
  0x97   :  { %277 = vmatmul.mubr.f32.gmra.mrb[42].mxu0 %v1269_v33 }
  0x98   :  { %281 = vmatprep.mubr.f32.mxu0 %v1274_v32 }
  0x9b   :  { %282 = vmatmul.mubr.f32.gmra.mrb[44].mxu0 %v1281_v30 }
  0x9c   :  { %286 = vmatprep.mubr.f32.mxu0 %v1286_v29 }
  0x9f   :  { %287 = vmatmul.mubr.f32.gmra.mrb[46].mxu0 %v1293_v27 }
  0xa0   :  { %291 = vmatprep.mubr.f32.mxu0 %v1298_v26 }
  0xa3   :  { %292 = vmatmul.mubr.f32.gmra.mrb[48].mxu0 %v1305_v24 }
  0xa4   :  { %296 = vmatprep.mubr.f32.mxu0 %v1310_v23 }
  0xa7   :  { %297 = vmatmul.mubr.f32.gmra.mrb[50].mxu0 %v1317_v21 }
  0xa8   :  { %301 = vmatprep.mubr.f32.mxu0 %v1322_v20 }
  0xab   :  { %302 = vmatmul.mubr.f32.gmra.mrb[52].mxu0 %v1329_v18 }
  0xac   :  { %306 = vmatprep.mubr.f32.mxu0 %v1334_v17 }
  0xaf   :  { %307 = vmatmul.mubr.f32.gmra.mrb[54].mxu0 %v1341_v15 }
  0xb0   :  { %311 = vmatprep.mubr.f32.mxu0 %v1346_v14 }
  0xb3   :  { %312 = vmatmul.mubr.f32.gmra.mrb[56].mxu0 %v1353_v11 }
  0xb4   :  { %316 = vmatprep.mubr.f32.mxu0 %v1358_v10 }
  0xb7   :  { %317 = vmatmul.mubr.f32.gmra.mrb[58].mxu0 %v1365_v8 }
  0xb8   :  { %321 = vmatprep.mubr.f32.mxu0 %v1370_v7 }
  0xbb   :  { %322 = vmatmul.mubr.f32.gmra.mrb[60].mxu0 %v1377_v5 }
  0xbc   :  { %326 = vmatprep.mubr.f32.mxu0 %v1382_v3  ;;  %v1847_v3 = vmov 0.0|0.0  }
  0xbf   :  { %327 = vmatmul.mubr.f32.gmra.mrb[62].mxu0 %v1389_v2 }
 0x116   :  { %v1392_v1 = vpop.f32.mrb[0].mxu0 }
 0x117   :  { %1844 = vst [vmem:[#allocation45_spill] sm:$0xff] %v1392_v1  ;;  %v175_v7 = vpop.f32.mrb[1].mxu0 }
 0x11a   :  { %v1394_v8 = vpop.f32.mrb[2].mxu0 }
 0x11b   :  { %1845 = vst [vmem:[#allocation46_spill] sm:$0xff] %v1394_v8  ;;  %v180_v10 = vpop.f32.mrb[3].mxu0  ;;  %v738_v11 = vpack.c.bf16 %v1394_v8, %v1392_v1 }
 0x11d   :  { %739 = vmatpush1.bf16.msra.mxu1 %v738_v11 }
 0x11e   :  { %v1398_v5 = vpop.f32.mrb[4].mxu0  ;;  %740 = vmatprep.subr.bf16.mxu1 %v1847_v3 }
 0x11f   :  { %1846 = vst [vmem:[#allocation47_spill] sm:$0xff] %v1398_v5  ;;  %v185_v14 = vpop.f32.mrb[5].mxu0 }
 0x122   :  { %v1401_v15 = vpop.f32.mrb[6].mxu0 }
 0x123   :  { %1848 = vst [vmem:[#allocation48_spill] sm:$0xff] %v1401_v15  ;;  %v741_v2 = vpack.c.bf16 %v1401_v15, %v1398_v5  ;;  %v190_v17 = vpop.f32.mrb[7].mxu0 }
 0x125   :  { %742 = vmatpush1.bf16.msra.mxu1 %v741_v2 }
 0x126   :  { %v1405_v7 = vpop.f32.mrb[8].mxu0  ;;  %743 = vmatprep.subr.bf16.mxu1 %v1847_v3 }
 0x127   :  { %1849 = vst [vmem:[#allocation49_spill] sm:$0xff] %v1405_v7  ;;  %v195_v10 = vpop.f32.mrb[9].mxu0 }
 0x12a   :  { %v1408_v18 = vpop.f32.mrb[10].mxu0 }
 0x12b   :  { %1850 = vst [vmem:[#allocation50_spill] sm:$0xff] %v1408_v18  ;;  %v744_v11 = vpack.c.bf16 %v1408_v18, %v1405_v7  ;;  %v200_v8 = vpop.f32.mrb[11].mxu0 }
 0x12d   :  { %745 = vmatpush1.bf16.msra.mxu1 %v744_v11 }
 0x12e   :  { %v1412_v14 = vpop.f32.mrb[12].mxu0  ;;  %746 = vmatprep.subr.bf16.mxu1 %v1847_v3 }
 0x12f   :  { %1851 = vst [vmem:[#allocation51_spill] sm:$0xff] %v1412_v14  ;;  %v205_v1 = vpop.f32.mrb[13].mxu0 }
 0x132   :  { %v1415_v15 = vpop.f32.mrb[14].mxu0 }
 0x133   :  { %1852 = vst [vmem:[#allocation52_spill] sm:$0xff] %v1415_v15  ;;  %v747_v2 = vpack.c.bf16 %v1415_v15, %v1412_v14  ;;  %v210_v17 = vpop.f32.mrb[15].mxu0 }
 0x135   :  { %748 = vmatpush1.bf16.msra.mxu1 %v747_v2 }
 0x136   :  { %v1419_v10 = vpop.f32.mrb[16].mxu0  ;;  %749 = vmatprep.subr.bf16.mxu1 %v1847_v3 }
 0x137   :  { %1853 = vst [vmem:[#allocation53_spill] sm:$0xff] %v1419_v10  ;;  %v215_v5 = vpop.f32.mrb[17].mxu0 }
 0x13a   :  { %v1422_v18 = vpop.f32.mrb[18].mxu0 }
 0x13b   :  { %1854 = vst [vmem:[#allocation54_spill] sm:$0xff] %v1422_v18  ;;  %v750_v8 = vpack.c.bf16 %v1422_v18, %v1419_v10  ;;  %v220_v11 = vpop.f32.mrb[19].mxu0 }
 0x13d   :  { %751 = vmatpush1.bf16.msra.mxu1 %v750_v8 }
 0x13e   :  { %v1426_v1 = vpop.f32.mrb[20].mxu0  ;;  %752 = vmatprep.subr.bf16.mxu1 %v1847_v3 }
 0x13f   :  { %1855 = vst [vmem:[#allocation55_spill] sm:$0xff] %v1426_v1  ;;  %v225_v7 = vpop.f32.mrb[21].mxu0 }
 0x142   :  { %v1429_v15 = vpop.f32.mrb[22].mxu0 }
 0x143   :  { %1856 = vst [vmem:[#allocation56_spill] sm:$0xff] %v1429_v15  ;;  %v753_v2 = vpack.c.bf16 %v1429_v15, %v1426_v1  ;;  %v230_v17 = vpop.f32.mrb[23].mxu0 }
 0x145   :  { %754 = vmatpush1.bf16.msra.mxu1 %v753_v2 }
 0x146   :  { %v1433_v5 = vpop.f32.mrb[24].mxu0  ;;  %755 = vmatprep.subr.bf16.mxu1 %v1847_v3 }
 0x147   :  { %1857 = vst [vmem:[#allocation57_spill] sm:$0xff] %v1433_v5  ;;  %v235_v14 = vpop.f32.mrb[25].mxu0 }
 0x14a   :  { %v1436_v18 = vpop.f32.mrb[26].mxu0 }
 0x14b   :  { %1858 = vst [vmem:[#allocation58_spill] sm:$0xff] %v1436_v18  ;;  %v756_v8 = vpack.c.bf16 %v1436_v18, %v1433_v5  ;;  %v240_v11 = vpop.f32.mrb[27].mxu0 }
 0x14d   :  { %757 = vmatpush1.bf16.msra.mxu1 %v756_v8 }
 0x14e   :  { %v1440_v7 = vpop.f32.mrb[28].mxu0  ;;  %758 = vmatprep.subr.bf16.mxu1 %v1847_v3 }
 0x14f   :  { %1859 = vst [vmem:[#allocation59_spill] sm:$0xff] %v1440_v7  ;;  %v245_v10 = vpop.f32.mrb[29].mxu0 }
 0x152   :  { %v1443_v15 = vpop.f32.mrb[30].mxu0 }
 0x153   :  { %1860 = vst [vmem:[#allocation60_spill] sm:$0xff] %v1443_v15  ;;  %v759_v2 = vpack.c.bf16 %v1443_v15, %v1440_v7  ;;  %v250_v17 = vpop.f32.mrb[31].mxu0 }
 0x155   :  { %760 = vmatpush1.bf16.msra.mxu1 %v759_v2 }
 0x156   :  { %v1447_v14 = vpop.f32.mrb[32].mxu0  ;;  %761 = vmatprep.subr.bf16.mxu1 %v1847_v3 }
 0x157   :  { %1861 = vst [vmem:[#allocation61_spill] sm:$0xff] %v1447_v14  ;;  %v255_v1 = vpop.f32.mrb[33].mxu0 }
 0x15a   :  { %v1450_v18 = vpop.f32.mrb[34].mxu0 }
 0x15b   :  { %1862 = vst [vmem:[#allocation62_spill] sm:$0xff] %v1450_v18  ;;  %v762_v8 = vpack.c.bf16 %v1450_v18, %v1447_v14  ;;  %v260_v11 = vpop.f32.mrb[35].mxu0 }
 0x15d   :  { %763 = vmatpush1.bf16.msra.mxu1 %v762_v8 }
 0x15e   :  { %v1454_v10 = vpop.f32.mrb[36].mxu0  ;;  %764 = vmatprep.subr.bf16.mxu1 %v1847_v3 }
 0x15f   :  { %1863 = vst [vmem:[#allocation63_spill] sm:$0xff] %v1454_v10  ;;  %v265_v5 = vpop.f32.mrb[37].mxu0 }
 0x162   :  { %v1457_v15 = vpop.f32.mrb[38].mxu0 }
 0x163   :  { %1864 = vst [vmem:[#allocation64_spill] sm:$0xff] %v1457_v15  ;;  %v765_v2 = vpack.c.bf16 %v1457_v15, %v1454_v10  ;;  %v270_v17 = vpop.f32.mrb[39].mxu0 }
 0x165   :  { %766 = vmatpush1.bf16.msra.mxu1 %v765_v2 }
 0x166   :  { %v1461_v1 = vpop.f32.mrb[40].mxu0  ;;  %767 = vmatprep.subr.bf16.mxu1 %v1847_v3 }
 0x167   :  { %1865 = vst [vmem:[#allocation65_spill] sm:$0xff] %v1461_v1  ;;  %v275_v7 = vpop.f32.mrb[41].mxu0 }
 0x16a   :  { %v1464_v18 = vpop.f32.mrb[42].mxu0 }
 0x16b   :  { %1866 = vst [vmem:[#allocation66_spill] sm:$0xff] %v1464_v18  ;;  %v768_v8 = vpack.c.bf16 %v1464_v18, %v1461_v1  ;;  %v280_v11 = vpop.f32.mrb[43].mxu0 }
 0x16d   :  { %769 = vmatpush1.bf16.msra.mxu1 %v768_v8 }
 0x16e   :  { %v1468_v5 = vpop.f32.mrb[44].mxu0  ;;  %770 = vmatprep.subr.bf16.mxu1 %v1847_v3 }
 0x16f   :  { %1867 = vst [vmem:[#allocation67_spill] sm:$0xff] %v1468_v5  ;;  %v285_v14 = vpop.f32.mrb[45].mxu0 }
 0x172   :  { %v1471_v15 = vpop.f32.mrb[46].mxu0 }
 0x173   :  { %1868 = vst [vmem:[#allocation68_spill] sm:$0xff] %v1471_v15  ;;  %v771_v2 = vpack.c.bf16 %v1471_v15, %v1468_v5  ;;  %v290_v17 = vpop.f32.mrb[47].mxu0 }
 0x175   :  { %772 = vmatpush1.bf16.msra.mxu1 %v771_v2 }
 0x176   :  { %v1475_v7 = vpop.f32.mrb[48].mxu0  ;;  %773 = vmatprep.subr.bf16.mxu1 %v1847_v3 }
 0x177   :  { %1869 = vst [vmem:[#allocation69_spill] sm:$0xff] %v1475_v7  ;;  %v295_v10 = vpop.f32.mrb[49].mxu0 }
 0x17a   :  { %v1478_v18 = vpop.f32.mrb[50].mxu0 }
 0x17b   :  { %1870 = vst [vmem:[#allocation70_spill] sm:$0xff] %v1478_v18  ;;  %v774_v8 = vpack.c.bf16 %v1478_v18, %v1475_v7  ;;  %v300_v11 = vpop.f32.mrb[51].mxu0 }
 0x17d   :  { %775 = vmatpush1.bf16.msra.mxu1 %v774_v8 }
 0x17e   :  { %v1482_v14 = vpop.f32.mrb[52].mxu0  ;;  %776 = vmatprep.subr.bf16.mxu1 %v1847_v3 }
 0x17f   :  { %v305_v1 = vpop.f32.mrb[53].mxu0 }
 0x182   :  { %v1485_v15 = vpop.f32.mrb[54].mxu0 }
 0x183   :  { %1871 = vst [vmem:[#allocation71_spill] sm:$0xff] %v1485_v15  ;;  %v777_v2 = vpack.c.bf16 %v1485_v15, %v1482_v14  ;;  %v310_v17 = vpop.f32.mrb[55].mxu0 }
 0x185   :  { %778 = vmatpush1.bf16.msra.mxu1 %v777_v2 }
 0x186   :  { %v1489_v10 = vpop.f32.mrb[56].mxu0  ;;  %779 = vmatprep.subr.bf16.mxu1 %v1847_v3 }
 0x187   :  { %v315_v5 = vpop.f32.mrb[57].mxu0 }
 0x188   :  { %v1896_v5 = vld [vmem:[#allocation51_spill] sm:$0xff] }
 0x18a   :  { %v1492_v18 = vpop.f32.mrb[58].mxu0 }
 0x18b   :  { %v780_v8 = vpack.c.bf16 %v1492_v18, %v1489_v10  ;;  %v320_v11 = vpop.f32.mrb[59].mxu0 }
 0x18d   :  { %781 = vmatpush1.bf16.msra.mxu1 %v780_v8 }
 0x18e   :  { %v1496_v1 = vpop.f32.mrb[60].mxu0  ;;  %782 = vmatprep.subr.bf16.mxu1 %v1847_v3  ;;  %v1873_v3 = vld [vmem:[#allocation35_spill] sm:$0xff] }
 0x18f   :  { %v325_v7 = vpop.f32.mrb[61].mxu0 }
 0x192   :  { %v1499_v15 = vpop.f32.mrb[62].mxu0 }
 0x193   :  { %v783_v2 = vpack.c.bf16 %v1499_v15, %v1496_v1  ;;  %v330_v17 = vpop.f32.mrb[63].mxu0 }
 0x195   :  { %784 = vmatpush1.bf16.msra.mxu1 %v783_v2 }
 0x198   :  { %429 = vmatmul.mubr.f32.vlgmr.msra.gmra.mrb[0].mxu1 %v1017_v50 }
 0x199   :  { %433 = vmatprep.mubr.f32.mxu1 %v1022_v51 }
 0x19c   :  { %434 = vmatmul.mubr.f32.gmra.mrb[2].mxu1 %v1029_v52  ;;  %v1887_v52 = vld [vmem:[#allocation4_spill] sm:$0xff] }
 0x19d   :  { %438 = vmatprep.mubr.f32.mxu1 %v1034_v53  ;;  %v1888_v53 = vld [vmem:[#allocation47_spill] sm:$0xff] }
 0x1a0   :  { %439 = vmatmul.mubr.f32.gmra.mrb[4].mxu1 %v1041_v54  ;;  %v334_v54 = vadd.f32 %v1888_v53, %v1887_v52 }
 0x1a1   :  { %443 = vmatprep.mubr.f32.mxu1 %v1046_v55 }
 0x1a4   :  { %444 = vmatmul.mubr.f32.gmra.mrb[6].mxu1 %v1053_v56 }
 0x1a5   :  { %448 = vmatprep.mubr.f32.mxu1 %v1058_v57 }
 0x1a8   :  { %449 = vmatmul.mubr.f32.gmra.mrb[8].mxu1 %v1065_v58 }
 0x1a9   :  { %453 = vmatprep.mubr.f32.mxu1 %v1070_v59  ;;  %v1889_v59 = vld [vmem:[#allocation5_spill] sm:$0xff] }
 0x1ac   :  { %454 = vmatmul.mubr.f32.gmra.mrb[10].mxu1 %v1077_v60  ;;  %v1890_v60 = vld [vmem:[#allocation48_spill] sm:$0xff] }
 0x1ad   :  { %458 = vmatprep.mubr.f32.mxu1 %v1082_v61  ;;  %v335_v61 = vadd.f32 %v1890_v60, %v1889_v59 }
 0x1b0   :  { %459 = vmatmul.mubr.f32.gmra.mrb[12].mxu1 %v1089_v62 }
 0x1b1   :  { %463 = vmatprep.mubr.f32.mxu1 %v1094_v63 }
 0x1b4   :  { %464 = vmatmul.mubr.f32.gmra.mrb[14].mxu1 %v1101_v4 }
 0x1b5   :  { %468 = vmatprep.mubr.f32.mxu1 %v1106_v6 }
 0x1b8   :  { %469 = vmatmul.mubr.f32.gmra.mrb[16].mxu1 %v1113_v9  ;;  %v1891_v9 = vld [vmem:[#allocation6_spill] sm:$0xff] }
 0x1b9   :  { %473 = vmatprep.mubr.f32.mxu1 %v1118_v12  ;;  %v1892_v12 = vld [vmem:[#allocation49_spill] sm:$0xff] }
 0x1bc   :  { %474 = vmatmul.mubr.f32.gmra.mrb[18].mxu1 %v1125_v13  ;;  %v336_v13 = vadd.f32 %v1892_v12, %v1891_v9 }
 0x1bd   :  { %478 = vmatprep.mubr.f32.mxu1 %v1130_v16 }
 0x1c0   :  { %479 = vmatmul.mubr.f32.gmra.mrb[20].mxu1 %v1137_v19 }
 0x1c1   :  { %483 = vmatprep.mubr.f32.mxu1 %v1142_v22 }
 0x1c4   :  { %484 = vmatmul.mubr.f32.gmra.mrb[22].mxu1 %v1149_v25 }
 0x1c5   :  { %488 = vmatprep.mubr.f32.mxu1 %v1154_v28  ;;  %v1893_v28 = vld [vmem:[#allocation7_spill] sm:$0xff] }
 0x1c8   :  { %489 = vmatmul.mubr.f32.gmra.mrb[24].mxu1 %v1161_v31  ;;  %v1894_v31 = vld [vmem:[#allocation50_spill] sm:$0xff] }
 0x1c9   :  { %493 = vmatprep.mubr.f32.mxu1 %v1166_v34  ;;  %v337_v34 = vadd.f32 %v1894_v31, %v1893_v28 }
 0x1cc   :  { %494 = vmatmul.mubr.f32.gmra.mrb[26].mxu1 %v1173_v37 }
 0x1cd   :  { %498 = vmatprep.mubr.f32.mxu1 %v1178_v40 }
 0x1d0   :  { %499 = vmatmul.mubr.f32.gmra.mrb[28].mxu1 %v1185_v43 }
 0x1d1   :  { %503 = vmatprep.mubr.f32.mxu1 %v1190_v46 }
 0x1d4   :  { %504 = vmatmul.mubr.f32.gmra.mrb[30].mxu1 %v1197_v49  ;;  %v1895_v49 = vld [vmem:[#allocation8_spill] sm:$0xff] }
 0x1d5   :  { %508 = vmatprep.mubr.f32.mxu1 %v1202_v0  ;;  %v1872_v0 = vld [vmem:[#allocation34_spill] sm:$0xff]  ;;  %v338_v7 = vadd.f32 %v1896_v5, %v1895_v49 }
 0x1d8   :  { %509 = vmatmul.mubr.f32.gmra.mrb[32].mxu1 %v1209_v48 }
 0x1d9   :  { %513 = vmatprep.mubr.f32.mxu1 %v1214_v47 }
 0x1dc   :  { %514 = vmatmul.mubr.f32.gmra.mrb[34].mxu1 %v1221_v45 }
 0x1dd   :  { %518 = vmatprep.mubr.f32.mxu1 %v1226_v44  ;;  %v1886_v44 = vld [vmem:[#allocation46_spill] sm:$0xff] }
 0x1e0   :  { %519 = vmatmul.mubr.f32.gmra.mrb[36].mxu1 %v1233_v42  ;;  %v1885_v42 = vld [vmem:[#allocation3_spill] sm:$0xff] }
 0x1e1   :  { %523 = vmatprep.mubr.f32.mxu1 %v1238_v41  ;;  %v333_v45 = vadd.f32 %v1886_v44, %v1885_v42 }
 0x1e4   :  { %524 = vmatmul.mubr.f32.gmra.mrb[38].mxu1 %v1245_v39 }
 0x1e5   :  { %528 = vmatprep.mubr.f32.mxu1 %v1250_v38 }
 0x1e8   :  { %529 = vmatmul.mubr.f32.gmra.mrb[40].mxu1 %v1257_v36 }
 0x1e9   :  { %533 = vmatprep.mubr.f32.mxu1 %v1262_v35  ;;  %v1884_v35 = vld [vmem:[#allocation45_spill] sm:$0xff] }
 0x1ec   :  { %534 = vmatmul.mubr.f32.gmra.mrb[42].mxu1 %v1269_v33  ;;  %v1883_v33 = vld [vmem:[#allocation2_spill] sm:$0xff] }
 0x1ed   :  { %538 = vmatprep.mubr.f32.mxu1 %v1274_v32  ;;  %v1874_v32 = vld [vmem:[#allocation36_spill] sm:$0xff]  ;;  %v332_v36 = vadd.f32 %v1884_v35, %v1883_v33 }
 0x1f0   :  { %539 = vmatmul.mubr.f32.gmra.mrb[44].mxu1 %v1281_v30  ;;  %v1875_v30 = vld [vmem:[#allocation37_spill] sm:$0xff] }
 0x1f1   :  { %543 = vmatprep.mubr.f32.mxu1 %v1286_v29  ;;  %v1876_v29 = vld [vmem:[#allocation38_spill] sm:$0xff] }
 0x1f4   :  { %544 = vmatmul.mubr.f32.gmra.mrb[46].mxu1 %v1293_v27  ;;  %v1877_v27 = vld [vmem:[#allocation39_spill] sm:$0xff] }
 0x1f5   :  { %548 = vmatprep.mubr.f32.mxu1 %v1298_v26  ;;  %v1878_v26 = vld [vmem:[#allocation40_spill] sm:$0xff] }
 0x1f8   :  { %549 = vmatmul.mubr.f32.gmra.mrb[48].mxu1 %v1305_v24  ;;  %v1879_v24 = vld [vmem:[#allocation41_spill] sm:$0xff] }
 0x1f9   :  { %553 = vmatprep.mubr.f32.mxu1 %v1310_v23  ;;  %v1880_v23 = vld [vmem:[#allocation42_spill] sm:$0xff] }
 0x1fc   :  { %554 = vmatmul.mubr.f32.gmra.mrb[50].mxu1 %v1317_v21  ;;  %v1881_v21 = vld [vmem:[#allocation43_spill] sm:$0xff] }
 0x1fd   :  { %558 = vmatprep.mubr.f32.mxu1 %v1322_v20  ;;  %v1882_v20 = vld [vmem:[#allocation44_spill] sm:$0xff] }
 0x200   :  { %559 = vmatmul.mubr.f32.gmra.mrb[52].mxu1 %v1872_v0  ;;  %v1897_v0 = vld [vmem:[#allocation9_spill] sm:$0xff] }
 0x201   :  { %563 = vmatprep.mubr.f32.mxu1 %v1873_v3  ;;  %v1898_v3 = vld [vmem:[#allocation52_spill] sm:$0xff] }
 0x204   :  { %564 = vmatmul.mubr.f32.gmra.mrb[54].mxu1 %v1874_v32  ;;  %v339_v32 = vadd.f32 %v1898_v3, %v1897_v0 }
 0x205   :  { %568 = vmatprep.mubr.f32.mxu1 %v1875_v30 }
 0x208   :  { %569 = vmatmul.mubr.f32.gmra.mrb[56].mxu1 %v1876_v29 }
 0x209   :  { %573 = vmatprep.mubr.f32.mxu1 %v1877_v27 }
 0x20c   :  { %574 = vmatmul.mubr.f32.gmra.mrb[58].mxu1 %v1878_v26 }
 0x20d   :  { %578 = vmatprep.mubr.f32.mxu1 %v1879_v24  ;;  %v1899_v24 = vld [vmem:[#allocation10_spill] sm:$0xff] }
 0x210   :  { %579 = vmatmul.mubr.f32.gmra.mrb[60].mxu1 %v1880_v23  ;;  %v1900_v23 = vld [vmem:[#allocation53_spill] sm:$0xff] }
 0x211   :  { %583 = vmatprep.mubr.f32.mxu1 %v1881_v21  ;;  %v340_v21 = vadd.f32 %v1900_v23, %v1899_v24 }
 0x214   :  { %584 = vmatmul.mubr.f32.gmra.mrb[62].mxu1 %v1882_v20 }
 0x26b   :  { %v430_v38 = vpop.f32.mrb[0].mxu1 }
 0x26c   :  { %v589_v39 = vadd.f32 %v430_v38, %v332_v36  ;;  %v432_v41 = vpop.f32.mrb[1].mxu1  ;;  %v1901_v38 = vld [vmem:[#allocation11_spill] sm:$0xff] }
 0x26e   :  { %v621_v47 = vmul.f32 0.33333334, %v589_v39  ;;  %v1902_v39 = vld [vmem:[#allocation54_spill] sm:$0xff] }
 0x26f   :  { %v435_v48 = vpop.f32.mrb[2].mxu1  ;;  %v341_v41 = vadd.f32 %v1902_v39, %v1901_v38 }
 0x270   :  { %653 = vst [vmem:[%s1728_s2] sm:$0xff] %v621_v47  ;;  %v590_v50 = vadd.f32 %v435_v48, %v333_v45  ;;  %v437_v51 = vpop.f32.mrb[3].mxu1  ;;  %v1903_v48 = vld [vmem:[#allocation12_spill] sm:$0xff] }
 0x272   :  { %v622_v55 = vmul.f32 0.33333334, %v590_v50  ;;  %v1904_v50 = vld [vmem:[#allocation55_spill] sm:$0xff] }
 0x273   :  { %v440_v56 = vpop.f32.mrb[4].mxu1  ;;  %v342_v51 = vadd.f32 %v1904_v50, %v1903_v48 }
 0x274   :  { %654 = vst [vmem:[%s1728_s2 + $0x8] sm:$0xff] %v622_v55  ;;  %v591_v57 = vadd.f32 %v440_v56, %v334_v54  ;;  %v442_v58 = vpop.f32.mrb[5].mxu1  ;;  %v1905_v56 = vld [vmem:[#allocation13_spill] sm:$0xff] }
 0x276   :  { %v623_v62 = vmul.f32 0.33333334, %v591_v57  ;;  %v1906_v57 = vld [vmem:[#allocation56_spill] sm:$0xff] }
 0x277   :  { %v445_v63 = vpop.f32.mrb[6].mxu1  ;;  %v343_v58 = vadd.f32 %v1906_v57, %v1905_v56 }
 0x278   :  { %655 = vst [vmem:[%s1728_s2 + $0x10] sm:$0xff] %v623_v62  ;;  %v592_v4 = vadd.f32 %v445_v63, %v335_v61  ;;  %v447_v6 = vpop.f32.mrb[7].mxu1  ;;  %v1907_v63 = vld [vmem:[#allocation14_spill] sm:$0xff] }
 0x27a   :  { %v624_v16 = vmul.f32 0.33333334, %v592_v4  ;;  %v1908_v4 = vld [vmem:[#allocation57_spill] sm:$0xff] }
 0x27b   :  { %v450_v19 = vpop.f32.mrb[8].mxu1  ;;  %v344_v6 = vadd.f32 %v1908_v4, %v1907_v63 }
 0x27c   :  { %656 = vst [vmem:[%s1728_s2 + $0x18] sm:$0xff] %v624_v16  ;;  %v593_v22 = vadd.f32 %v450_v19, %v336_v13  ;;  %v452_v25 = vpop.f32.mrb[9].mxu1  ;;  %v1909_v19 = vld [vmem:[#allocation15_spill] sm:$0xff] }
 0x27e   :  { %v625_v37 = vmul.f32 0.33333334, %v593_v22  ;;  %v1910_v22 = vld [vmem:[#allocation58_spill] sm:$0xff] }
 0x27f   :  { %v455_v40 = vpop.f32.mrb[10].mxu1  ;;  %v345_v25 = vadd.f32 %v1910_v22, %v1909_v19 }
 0x280   :  { %657 = vst [vmem:[%s1728_s2 + $0x20] sm:$0xff] %v625_v37  ;;  %v594_v43 = vadd.f32 %v455_v40, %v337_v34  ;;  %v457_v46 = vpop.f32.mrb[11].mxu1  ;;  %v1911_v40 = vld [vmem:[#allocation16_spill] sm:$0xff] }
 0x282   :  { %v626_v8 = vmul.f32 0.33333334, %v594_v43  ;;  %v1912_v43 = vld [vmem:[#allocation59_spill] sm:$0xff] }
 0x283   :  { %v460_v11 = vpop.f32.mrb[12].mxu1  ;;  %v346_v46 = vadd.f32 %v1912_v43, %v1911_v40 }
 0x284   :  { %658 = vst [vmem:[%s1728_s2 + $0x28] sm:$0xff] %v626_v8  ;;  %v595_v2 = vadd.f32 %v460_v11, %v338_v7  ;;  %v462_v17 = vpop.f32.mrb[13].mxu1  ;;  %v1913_v11 = vld [vmem:[#allocation17_spill] sm:$0xff] }
 0x286   :  { %v627_v30 = vmul.f32 0.33333334, %v595_v2  ;;  %v1914_v2 = vld [vmem:[#allocation60_spill] sm:$0xff] }
 0x287   :  { %v465_v29 = vpop.f32.mrb[14].mxu1  ;;  %v347_v17 = vadd.f32 %v1914_v2, %v1913_v11 }
 0x288   :  { %659 = vst [vmem:[%s1728_s2 + $0x30] sm:$0xff] %v627_v30  ;;  %v596_v27 = vadd.f32 %v465_v29, %v339_v32  ;;  %v467_v26 = vpop.f32.mrb[15].mxu1  ;;  %v1915_v29 = vld [vmem:[#allocation18_spill] sm:$0xff] }
 0x28a   :  { %v628_v20 = vmul.f32 0.33333334, %v596_v27  ;;  %v1916_v27 = vld [vmem:[#allocation61_spill] sm:$0xff] }
 0x28b   :  { %v470_v33 = vpop.f32.mrb[16].mxu1  ;;  %v348_v26 = vadd.f32 %v1916_v27, %v1915_v29 }
 0x28c   :  { %660 = vst [vmem:[%s1728_s2 + $0x38] sm:$0xff] %v628_v20  ;;  %v597_v35 = vadd.f32 %v470_v33, %v340_v21  ;;  %v472_v36 = vpop.f32.mrb[17].mxu1  ;;  %v1917_v33 = vld [vmem:[#allocation19_spill] sm:$0xff] }
 0x28e   :  { %v629_v42 = vmul.f32 0.33333334, %v597_v35  ;;  %v1918_v35 = vld [vmem:[#allocation62_spill] sm:$0xff] }
 0x28f   :  { %v475_v44 = vpop.f32.mrb[18].mxu1  ;;  %v349_v36 = vadd.f32 %v1918_v35, %v1917_v33 }
 0x290   :  { %661 = vst [vmem:[%s1728_s2 + $0x40] sm:$0xff] %v629_v42  ;;  %v598_v45 = vadd.f32 %v475_v44, %v341_v41  ;;  %v477_v47 = vpop.f32.mrb[19].mxu1  ;;  %v1919_v44 = vld [vmem:[#allocation20_spill] sm:$0xff] }
 0x292   :  { %v630_v52 = vmul.f32 0.33333334, %v598_v45  ;;  %v1920_v45 = vld [vmem:[#allocation63_spill] sm:$0xff] }
 0x293   :  { %v480_v53 = vpop.f32.mrb[20].mxu1  ;;  %v350_v47 = vadd.f32 %v1920_v45, %v1919_v44 }
 0x294   :  { %662 = vst [vmem:[%s1728_s2 + $0x48] sm:$0xff] %v630_v52  ;;  %v599_v54 = vadd.f32 %v480_v53, %v342_v51  ;;  %v482_v55 = vpop.f32.mrb[21].mxu1  ;;  %v1921_v53 = vld [vmem:[#allocation21_spill] sm:$0xff] }
 0x296   :  { %v631_v59 = vmul.f32 0.33333334, %v599_v54  ;;  %v1922_v54 = vld [vmem:[#allocation64_spill] sm:$0xff] }
 0x297   :  { %v485_v60 = vpop.f32.mrb[22].mxu1  ;;  %v351_v55 = vadd.f32 %v1922_v54, %v1921_v53 }
 0x298   :  { %663 = vst [vmem:[%s1728_s2 + $0x50] sm:$0xff] %v631_v59  ;;  %v600_v61 = vadd.f32 %v485_v60, %v343_v58  ;;  %v487_v62 = vpop.f32.mrb[23].mxu1  ;;  %v1923_v60 = vld [vmem:[#allocation22_spill] sm:$0xff] }
 0x29a   :  { %v632_v9 = vmul.f32 0.33333334, %v600_v61  ;;  %v1924_v61 = vld [vmem:[#allocation65_spill] sm:$0xff] }
 0x29b   :  { %v490_v12 = vpop.f32.mrb[24].mxu1  ;;  %v352_v62 = vadd.f32 %v1924_v61, %v1923_v60  ;;  %v1939_v61 = vld [vmem:[#allocation31_spill] sm:$0xff] }
 0x29c   :  { %664 = vst [vmem:[%s1728_s2 + $0x58] sm:$0xff] %v632_v9  ;;  %v601_v13 = vadd.f32 %v490_v12, %v344_v6  ;;  %v492_v16 = vpop.f32.mrb[25].mxu1  ;;  %v1925_v12 = vld [vmem:[#allocation23_spill] sm:$0xff] }
 0x29e   :  { %v633_v28 = vmul.f32 0.33333334, %v601_v13  ;;  %v1926_v13 = vld [vmem:[#allocation66_spill] sm:$0xff] }
 0x29f   :  { %v495_v31 = vpop.f32.mrb[26].mxu1  ;;  %v353_v16 = vadd.f32 %v1926_v13, %v1925_v12 }
 0x2a0   :  { %665 = vst [vmem:[%s1728_s2 + $0x60] sm:$0xff] %v633_v28  ;;  %v602_v34 = vadd.f32 %v495_v31, %v345_v25  ;;  %v497_v37 = vpop.f32.mrb[27].mxu1  ;;  %v1927_v31 = vld [vmem:[#allocation24_spill] sm:$0xff] }
 0x2a2   :  { %v634_v49 = vmul.f32 0.33333334, %v602_v34  ;;  %v1928_v34 = vld [vmem:[#allocation67_spill] sm:$0xff] }
 0x2a3   :  { %v500_v5 = vpop.f32.mrb[28].mxu1  ;;  %v354_v37 = vadd.f32 %v1928_v34, %v1927_v31 }
 0x2a4   :  { %666 = vst [vmem:[%s1728_s2 + $0x68] sm:$0xff] %v634_v49  ;;  %v603_v7 = vadd.f32 %v500_v5, %v346_v46  ;;  %v502_v8 = vpop.f32.mrb[29].mxu1  ;;  %v1929_v5 = vld [vmem:[#allocation25_spill] sm:$0xff] }
 0x2a6   :  { %v635_v0 = vmul.f32 0.33333334, %v603_v7  ;;  %v1930_v7 = vld [vmem:[#allocation68_spill] sm:$0xff] }
 0x2a7   :  { %v505_v3 = vpop.f32.mrb[30].mxu1  ;;  %v355_v8 = vadd.f32 %v1930_v7, %v1929_v5 }
 0x2a8   :  { %667 = vst [vmem:[%s1728_s2 + $0x70] sm:$0xff] %v635_v0  ;;  %v604_v32 = vadd.f32 %v505_v3, %v347_v17  ;;  %v507_v30 = vpop.f32.mrb[31].mxu1  ;;  %v1931_v3 = vld [vmem:[#allocation26_spill] sm:$0xff] }
 0x2aa   :  { %v636_v24 = vmul.f32 0.33333334, %v604_v32  ;;  %v1932_v32 = vld [vmem:[#allocation69_spill] sm:$0xff] }
 0x2ab   :  { %v510_v23 = vpop.f32.mrb[32].mxu1  ;;  %v356_v30 = vadd.f32 %v1932_v32, %v1931_v3 }
 0x2ac   :  { %668 = vst [vmem:[%s1728_s2 + $0x78] sm:$0xff] %v636_v24  ;;  %v605_v21 = vadd.f32 %v510_v23, %v348_v26  ;;  %v512_v20 = vpop.f32.mrb[33].mxu1  ;;  %v1933_v23 = vld [vmem:[#allocation27_spill] sm:$0xff] }
 0x2ae   :  { %v637_v38 = vmul.f32 0.33333334, %v605_v21  ;;  %v1934_v21 = vld [vmem:[#allocation70_spill] sm:$0xff] }
 0x2af   :  { %v515_v39 = vpop.f32.mrb[34].mxu1  ;;  %v357_v20 = vadd.f32 %v1934_v21, %v1933_v23 }
 0x2b0   :  { %669 = vst [vmem:[%s1728_s2 + $0x80] sm:$0xff] %v637_v38  ;;  %v606_v41 = vadd.f32 %v515_v39, %v349_v36  ;;  %v517_v42 = vpop.f32.mrb[35].mxu1  ;;  %v1935_v39 = vld [vmem:[#allocation28_spill] sm:$0xff] }
 0x2b2   :  { %v638_v48 = vmul.f32 0.33333334, %v606_v41  ;;  %v358_v41 = vadd.f32 %v1482_v14, %v1935_v39  ;;  %v1938_v14 = vld [vmem:[#allocation30_spill] sm:$0xff] }
 0x2b3   :  { %v520_v50 = vpop.f32.mrb[36].mxu1 }
 0x2b4   :  { %670 = vst [vmem:[%s1728_s2 + $0x88] sm:$0xff] %v638_v48  ;;  %v607_v51 = vadd.f32 %v520_v50, %v350_v47  ;;  %v522_v52 = vpop.f32.mrb[37].mxu1  ;;  %v1936_v48 = vld [vmem:[#allocation29_spill] sm:$0xff]  ;;  %v1937_v50 = vld [vmem:[#allocation71_spill] sm:$0xff] }
 0x2b6   :  { %v639_v56 = vmul.f32 0.33333334, %v607_v51  ;;  %v359_v51 = vadd.f32 %v1937_v50, %v1936_v48 }
 0x2b7   :  { %v525_v57 = vpop.f32.mrb[38].mxu1 }
 0x2b8   :  { %671 = vst [vmem:[%s1728_s2 + $0x90] sm:$0xff] %v639_v56  ;;  %v608_v58 = vadd.f32 %v525_v57, %v351_v55  ;;  %v527_v59 = vpop.f32.mrb[39].mxu1  ;;  %v360_v56 = vadd.f32 %v1489_v10, %v1938_v14  ;;  %v1940_v10 = vld [vmem:[#allocation32_spill] sm:$0xff] }
 0x2b9   :  { %v362_v12 = vadd.f32 %v1496_v1, %v1940_v10 }
 0x2ba   :  { %v640_v63 = vmul.f32 0.33333334, %v608_v58 }
 0x2bb   :  { %v530_v4 = vpop.f32.mrb[40].mxu1 }
 0x2bc   :  { %672 = vst [vmem:[%s1728_s2 + $0x98] sm:$0xff] %v640_v63  ;;  %v609_v6 = vadd.f32 %v530_v4, %v352_v62  ;;  %v532_v9 = vpop.f32.mrb[41].mxu1  ;;  %v361_v62 = vadd.f32 %v1492_v18, %v1939_v61  ;;  %v1941_v18 = vld [vmem:[#allocation33_spill] sm:$0xff] }
 0x2be   :  { %v641_v19 = vmul.f32 0.33333334, %v609_v6 }
 0x2bf   :  { %v535_v22 = vpop.f32.mrb[42].mxu1 }
 0x2c0   :  { %673 = vst [vmem:[%s1728_s2 + $0xa0] sm:$0xff] %v641_v19  ;;  %v610_v25 = vadd.f32 %v535_v22, %v353_v16  ;;  %v537_v28 = vpop.f32.mrb[43].mxu1 }
 0x2c2   :  { %v642_v40 = vmul.f32 0.33333334, %v610_v25  ;;  %v363_v25 = vadd.f32 %v1499_v15, %v1941_v18 }
 0x2c3   :  { %v540_v43 = vpop.f32.mrb[44].mxu1 }
 0x2c4   :  { %674 = vst [vmem:[%s1728_s2 + $0xa8] sm:$0xff] %v642_v40  ;;  %v611_v46 = vadd.f32 %v540_v43, %v354_v37  ;;  %v542_v49 = vpop.f32.mrb[45].mxu1 }
 0x2c6   :  { %v643_v11 = vmul.f32 0.33333334, %v611_v46 }
 0x2c7   :  { %v545_v2 = vpop.f32.mrb[46].mxu1 }
 0x2c8   :  { %675 = vst [vmem:[%s1728_s2 + $0xb0] sm:$0xff] %v643_v11  ;;  %v612_v17 = vadd.f32 %v545_v2, %v355_v8  ;;  %v547_v0 = vpop.f32.mrb[47].mxu1 }
 0x2ca   :  { %v644_v29 = vmul.f32 0.33333334, %v612_v17 }
 0x2cb   :  { %v550_v27 = vpop.f32.mrb[48].mxu1 }
 0x2cc   :  { %676 = vst [vmem:[%s1728_s2 + $0xb8] sm:$0xff] %v644_v29  ;;  %v613_v26 = vadd.f32 %v550_v27, %v356_v30  ;;  %v552_v24 = vpop.f32.mrb[49].mxu1 }
 0x2ce   :  { %v645_v33 = vmul.f32 0.33333334, %v613_v26 }
 0x2cf   :  { %v555_v35 = vpop.f32.mrb[50].mxu1 }
 0x2d0   :  { %677 = vst [vmem:[%s1728_s2 + $0xc0] sm:$0xff] %v645_v33  ;;  %v614_v36 = vadd.f32 %v555_v35, %v357_v20  ;;  %v557_v38 = vpop.f32.mrb[51].mxu1 }
 0x2d2   :  { %v646_v42 = vmul.f32 0.33333334, %v614_v36 }
 0x2d3   :  { %v560_v44 = vpop.f32.mrb[52].mxu1 }
 0x2d4   :  { %678 = vst [vmem:[%s1728_s2 + $0xc8] sm:$0xff] %v646_v42  ;;  %v615_v45 = vadd.f32 %v560_v44, %v358_v41  ;;  %v562_v47 = vpop.f32.mrb[53].mxu1 }
 0x2d6   :  { %v647_v52 = vmul.f32 0.33333334, %v615_v45 }
 0x2d7   :  { %v565_v53 = vpop.f32.mrb[54].mxu1 }
 0x2d8   :  { %679 = vst [vmem:[%s1728_s2 + $0xd0] sm:$0xff] %v647_v52  ;;  %v616_v54 = vadd.f32 %v565_v53, %v359_v51  ;;  %v567_v55 = vpop.f32.mrb[55].mxu1 }
 0x2da   :  { %v648_v57 = vmul.f32 0.33333334, %v616_v54 }
 0x2db   :  { %v570_v58 = vpop.f32.mrb[56].mxu1 }
 0x2dc   :  { %680 = vst [vmem:[%s1728_s2 + $0xd8] sm:$0xff] %v648_v57  ;;  %v617_v59 = vadd.f32 %v570_v58, %v360_v56  ;;  %v572_v60 = vpop.f32.mrb[57].mxu1 }
 0x2de   :  { %v649_v63 = vmul.f32 0.33333334, %v617_v59 }
 0x2df   :  { %v575_v4 = vpop.f32.mrb[58].mxu1 }
 0x2e0   :  { %681 = vst [vmem:[%s1728_s2 + $0xe0] sm:$0xff] %v649_v63  ;;  %v618_v6 = vadd.f32 %v575_v4, %v361_v62  ;;  %v577_v9 = vpop.f32.mrb[59].mxu1 }
 0x2e2   :  { %v650_v13 = vmul.f32 0.33333334, %v618_v6 }
 0x2e3   :  { %v580_v16 = vpop.f32.mrb[60].mxu1 }
 0x2e4   :  { %682 = vst [vmem:[%s1728_s2 + $0xe8] sm:$0xff] %v650_v13  ;;  %v619_v19 = vadd.f32 %v580_v16, %v362_v12  ;;  %v582_v22 = vpop.f32.mrb[61].mxu1 }
 0x2e6   :  { %v651_v28 = vmul.f32 0.33333334, %v619_v19 }
 0x2e7   :  { %v585_v31 = vpop.f32.mrb[62].mxu1 }
 0x2e8   :  { %683 = vst [vmem:[%s1728_s2 + $0xf0] sm:$0xff] %v651_v28  ;;  %v620_v34 = vadd.f32 %v585_v31, %v363_v25  ;;  %v587_v37 = vpop.f32.mrb[63].mxu1 }
 0x2ea   :  { %v652_v1 = vmul.f32 0.33333334, %v620_v34 }
 0x2ec   :  { %684 = vst [vmem:[%s1728_s2 + $0xf8] sm:$0xff] %v652_v1 }

</bundles_post_ra>
